<compile_context>
chip_gen: v7x
topology: tpu7x:2x2x1
jax: 0.10.0
libtpu: 0.0.40
codegen_flags: <defaults>
</compile_context>

<pallas_src>
import functools

import jax
import jax.numpy as jnp
from jax import lax
from jax.experimental import pallas as pl
from jax.experimental.pallas import tpu as pltpu

W_CC = 1.0
W_MSE = 0.5


def _cdiv(a, b):
    return (a + b - 1) // b


def _round_up(a, b):
    return _cdiv(a, b) * b


def _vmem_capacity_bytes():
    try:
        return int(pltpu.get_tpu_info().vmem_capacity_bytes)
    except Exception:
        return 64 * 1024 * 1024  # v7x per-TensorCore capacity: a safe floor everywhere


def _plan(n_rows, n_cols, itemsizes, tile_rows, tile_cols, num_parts):
    """Generation-aware tiling plan.

    Returns (tile_rows, tile_cols, col_tiles, num_parts, tiles_per_part,
             num_row_tiles, vmem_limit_bytes, buffer_count).
    """
    vmem_cap = _vmem_capacity_bytes()
    budget = int(0.38 * vmem_cap)            # double-buffered inputs + f32 temporaries

    # Sublane granule of the narrowest streamed dtype (int8 packs 32 rows / vreg).
    min_item = min(itemsizes)
    row_granule = {1: 32, 2: 16}.get(min_item, 8)
    in_bytes = sum(itemsizes)                # pred + gt + mask bytes per element
    dma_per_elem = 2 * in_bytes              # double-buffered by the pipeline
    tmp_per_elem = 6 * 4                     # conservative: ~6 live f32 temporaries
    per_elem = dma_per_elem + tmp_per_elem

    rows_padded = _round_up(n_rows, row_granule)

    # ---- column tiling: only when a full-width row-granule slab will not fit ----
    if tile_cols is None:
        if row_granule * n_cols * per_elem <= budget:
            tile_cols = n_cols
        else:
            tile_cols = (budget // (row_granule * per_elem) // 128) * 128
            tile_cols = max(128, min(tile_cols, _round_up(n_cols, 128)))
    else:
        tile_cols = int(tile_cols)
        if tile_cols != n_cols:
            tile_cols = max(128, (tile_cols // 128) * 128)
        tile_cols = min(tile_cols, _round_up(n_cols, 128))
    col_tiles = _cdiv(n_cols, tile_cols)

    # ---- row tiling ----
    if tile_rows is None:
        tile_rows = (budget // (per_elem * tile_cols) // row_granule) * row_granule
        tile_rows = max(row_granule, min(tile_rows, 1024, rows_padded))
        # Prefer an even number of row tiles so two TensorCores (v7x) split evenly
        # and no phantom duplicate tile is ever streamed.
        nrt = _cdiv(n_rows, tile_rows)
        if nrt > 1 and nrt % 2 == 1:
            cand = _round_up(_cdiv(n_rows, nrt + 1), row_granule)
            if cand >= row_granule and _cdiv(n_rows, cand) % 2 == 0:
                tile_rows = cand
    else:
        tile_rows = max(row_granule, (int(tile_rows) // row_granule) * row_granule)
        tile_rows = min(tile_rows, rows_padded)

    num_row_tiles = _cdiv(n_rows, tile_rows)

    if num_parts is None:
        num_parts = 2 if (num_row_tiles >= 2 and num_row_tiles % 2 == 0) else 1
    num_parts = max(1, min(int(num_parts), num_row_tiles))
    tiles_per_part = _cdiv(num_row_tiles, num_parts)

    # ---- pipeline depth: triple-buffer tiny tiles over long grids ----
    tile_bytes = in_bytes * tile_rows * tile_cols
    buffer_count = 3 if (tile_bytes <= 2 * 1024 * 1024
                         and tiles_per_part * col_tiles >= 4) else 2

    # ---- scoped-VMEM limit: generous, but strictly below physical capacity ----
    vmem_limit = (7 * vmem_cap) // 8         # ~56 MiB on v7x, ~112 MiB on v5e/v6e

    return (tile_rows, tile_cols, col_tiles, num_parts, tiles_per_part,
            num_row_tiles, int(vmem_limit), buffer_count)


def _vac_kernel(pred_ref, gt_ref, mask_ref, out_ref, *mom_refs,
                n_rows, n_cols, tile_rows, tile_cols, tiles_per_part, col_tiles):
    part = pl.program_id(0)
    rstep = pl.program_id(1)
    cstep = pl.program_id(2)

    f32 = jnp.float32
    zero = f32(0.0)

    # Init this part's packed-stats accumulator block on its first grid step.
    @pl.when(jnp.logical_and(rstep == 0, cstep == 0))
    def _init_out():
        out_ref[...] = jnp.zeros_like(out_ref)

    # ---- single pass over the (tile_rows, tile_cols) block: raw moments only ----
    p = pred_ref[...].astype(f32)
    t = gt_ref[...].astype(f32)
    m = mask_ref[...]
    if m.dtype.itemsize < 4 and jnp.issubdtype(m.dtype, jnp.integer):
        m = m.astype(jnp.int32)              # robust sub-word int -> f32 path
    m = m.astype(f32)

    if n_cols % tile_cols != 0:
        # Ragged trailing column tile: zero out-of-range lanes with a *select*
        # so NaN/Inf garbage past the array end cannot leak into valid rows.
        cid = cstep * tile_cols + lax.broadcasted_iota(jnp.int32, (1, tile_cols), 1)
        cvalid = cid < n_cols
        p = jnp.where(cvalid, p, zero)
        t = jnp.where(cvalid, t, zero)
        m = jnp.where(cvalid, m, zero)

    pt = p * t
    sums = (
        jnp.sum(p, axis=-1, keepdims=True),       # Σ p
        jnp.sum(t, axis=-1, keepdims=True),       # Σ t
        jnp.sum(p * p, axis=-1, keepdims=True),   # Σ p²
        jnp.sum(t * t, axis=-1, keepdims=True),   # Σ t²
        jnp.sum(pt, axis=-1, keepdims=True),      # Σ p·t
        jnp.sum(m, axis=-1, keepdims=True),       # Σ m
        jnp.sum(m * p, axis=-1, keepdims=True),   # Σ m·p
        jnp.sum(m * t, axis=-1, keepdims=True),   # Σ m·t
        jnp.sum(m * pt, axis=-1, keepdims=True),  # Σ m·p·t
    )

    def _finalize(moms):
        sp, st, spp, stt, spt, sm, smp, smt, smpt = moms
        eps = f32(jnp.finfo(jnp.float32).eps)
        inv_n = f32(1.0 / n_cols)
        nm1 = f32(n_cols - 1)
        inv_nm1 = f32(1.0 / max(n_cols - 1, 1))   # n_cols==1 is degenerate, like torch ddof=1

        # Logical rows of this tile from the UNCLAMPED tile index, so padded rows of
        # the ragged last tile (and any phantom duplicate tile) contribute nothing.
        tile_idx = part * tiles_per_part + rstep
        row_ids = tile_idx * tile_rows + lax.broadcasted_iota(
            jnp.int32, (tile_rows, 1), 0)
        valid = row_ids < n_rows
        # Select (NOT multiply) so NaN/Inf garbage cannot leak into the sums.
        sp, st, spp, stt, spt, sm, smp, smt, smpt = [
            jnp.where(valid, x, zero)
            for x in (sp, st, spp, stt, spt, sm, smp, smt, smpt)]

        p_mean = sp * inv_n
        t_mean = st * inv_n
        p_var = jnp.maximum((spp - sp * p_mean) * inv_nm1, zero)
        t_var = jnp.maximum((stt - st * t_mean) * inv_nm1, zero)
        p_std = jnp.sqrt(p_var)
        t_std = jnp.sqrt(t_var)

        # Exact per-row reciprocals (approx EUP rcp would eat the 1e-5 budget);
        # they act on (tile_rows, 1) vectors only, not per-element data.  Target
        # std carries no eps (matches the PyTorch module), so a constant target
        # row still yields Inf/NaN.  Invalid rows are zeroed so their Inf cannot
        # poison the accumulators.
        inv_p = jnp.where(valid, pl.reciprocal(p_std + eps, approx=False), zero)
        inv_t = jnp.where(valid, pl.reciprocal(t_std, approx=False), zero)
        ipit = inv_p * inv_t

        # Σ m·(p - p̄)(t - t̄), folded out of the element pass.
        mcross = smpt - p_mean * smt - t_mean * smp + p_mean * t_mean * sm

        contrib = (
            sm,                                # Σ mask
            mcross * ipit,                     # Σ mask·pn·tn
            nm1 * p_var * (inv_p * inv_p),     # Σ pn²
            nm1 * t_var * (inv_t * inv_t),     # Σ tn²
            (spt - sp * t_mean) * ipit,        # Σ pn·tn
        )
        # Pack the 5 per-tile scalars into lanes 0..4 of the resident, lane-dense
        # (8, 128) accumulator block: no per-step lane-sparse accumulator traffic,
        # one unmasked writeback per part.
        lane = lax.broadcasted_iota(jnp.int32, out_ref.shape, 1)
        upd = jnp.zeros(out_ref.shape, f32)
        for j, c in enumerate(contrib):
            upd = upd + jnp.where(lane == j,
                                  jnp.sum(c, axis=0, keepdims=True), zero)
        out_ref[...] += upd

    if col_tiles == 1:
        # Full-width rows: finalize directly from the single-pass moments.
        _finalize(sums)
    else:
        # Column-tiled path: carry the 9 per-row partial moments in VMEM scratch
        # across column tiles; finalize on the last one.
        @pl.when(cstep == 0)
        def _reset_moments():
            for r in mom_refs:
                r[...] = jnp.zeros_like(r)

        for r, s in zip(mom_refs, sums):
            r[...] += s

        @pl.when(cstep == col_tiles - 1)
        def _finalize_row_tile():
            _finalize(tuple(r[...] for r in mom_refs))


def _make_in_spec(block_shape, index_map, buffer_count):
    if buffer_count > 2:
        try:
            return pl.BlockSpec(block_shape, index_map,
                                pipeline_mode=pl.Buffered(buffer_count))
        except Exception:
            pass  # fall back to default double buffering
    return pl.BlockSpec(block_shape, index_map)


def vac_loss(pred, gt_s, overlap_mask, *, mask_dtype=jnp.bfloat16,
             tile_rows=None, tile_cols=None, num_parts=None):
    """pred, gt_s, overlap_mask: (B, C, H, W).  Returns the scalar VAC loss (f32).

    mask_dtype controls how the overlap mask is streamed from HBM:
      * jnp.bfloat16 (default) - exact for {0,1} masks, halves mask HBM traffic
      * jnp.int8               - exact for integer-valued masks, 1 B/elem (best on v5e)
      * None                   - keep the caller's dtype
    Integer / bool masks are shipped as int8 automatically.
    """
    B, C, H, W = pred.shape
    R, N = B * C, H * W
    pred2 = pred.reshape(R, N)
    gt2 = gt_s.reshape(R, N)
    mask2 = overlap_mask.reshape(R, N)
    if jnp.issubdtype(mask2.dtype, jnp.integer) or mask2.dtype == jnp.bool_:
        mask2 = mask2.astype(jnp.int8)
    elif mask_dtype is not None:
        mask2 = mask2.astype(mask_dtype)

    itemsizes = (pred2.dtype.itemsize, gt2.dtype.itemsize, mask2.dtype.itemsize)
    (tile_rows, tile_cols, col_tiles, num_parts, tiles_per_part, num_row_tiles,
     vmem_limit, buffer_count) = _plan(R, N, itemsizes, tile_rows, tile_cols,
                                       num_parts)

    def in_map(c, i, k):
        # Clamp so an over-provisioned part stays in bounds; the clamped tile's
        # *logical* rows are >= R, so the in-kernel row-validity select zeroes it.
        return (jnp.minimum(c * tiles_per_part + i, num_row_tiles - 1), k)

    in_spec = _make_in_spec((tile_rows, tile_cols), in_map, buffer_count)
    out_spec = pl.BlockSpec((8, 128), lambda c, i, k: (c, 0))
    out_shape = jax.ShapeDtypeStruct((num_parts * 8, 128), jnp.float32)

    scratch_shapes = ([] if col_tiles == 1 else
                      [pltpu.VMEM((tile_rows, 1), jnp.float32) for _ in range(9)])

    kernel = functools.partial(
        _vac_kernel, n_rows=R, n_cols=N, tile_rows=tile_rows, tile_cols=tile_cols,
        tiles_per_part=tiles_per_part, col_tiles=col_tiles)

    acc = pl.pallas_call(
        kernel,
        out_shape=out_shape,
        grid=(num_parts, tiles_per_part, col_tiles),
        in_specs=[in_spec, in_spec, in_spec],
        out_specs=out_spec,
        scratch_shapes=scratch_shapes,
        compiler_params=pltpu.CompilerParams(
            dimension_semantics=("parallel", "arbitrary", "arbitrary"),
            vmem_limit_bytes=vmem_limit),
    )(pred2, gt2, mask2)

    # Tiny scalar finalize on the 5 packed global sums (kept in JAX so the per-part
    # / per-core partial reductions can be merged).
    stats = jnp.sum(acc.reshape(num_parts, 8, 128)[:, 0, :5], axis=0)
    s_m, s_cross, s_pp, s_tt, s_pt = (stats[0], stats[1], stats[2],
                                      stats[3], stats[4])

    size = jnp.float32(R * N)
    cc_corr = s_cross / jnp.sqrt(s_pp * s_tt)
    range_max = jnp.maximum(jnp.float32(1.0), s_m / size)
    cc = range_max - cc_corr
    mse = (s_pp + s_tt - 2.0 * s_pt) / size
    return cc * jnp.float32(W_CC) + mse * jnp.float32(W_MSE)


def _vac_loss_ref(pred, gt_s, overlap_mask):
    """Pure-JAX reference mirroring the PyTorch module (correctness check)."""
    eps = jnp.float32(jnp.finfo(jnp.float32).eps)
    p = pred.astype(jnp.float32)
    t = gt_s.astype(jnp.float32)
    m = overlap_mask.astype(jnp.float32)

    def norm(x, add_eps):
        mean = jnp.mean(x, axis=(-2, -1), keepdims=True)
        std = jnp.std(x, axis=(-2, -1), keepdims=True, ddof=1)
        return (x - mean) / (std + (eps if add_eps else 0.0))

    pn = norm(p, True)
    tn = norm(t, False)
    cc_corr = jnp.sum(m * pn * tn) / jnp.sqrt(jnp.sum(pn * pn) * jnp.sum(tn * tn))
    range_max = jnp.maximum(1.0, jnp.mean(m))
    cc = range_max - cc_corr
    mse = jnp.mean((pn - tn) ** 2)
    return cc * W_CC + mse * W_MSE


def _run_case(key, shape, **kwargs):
    k1, k2, k3 = jax.random.split(key, 3)
    pred = jax.random.uniform(k1, shape, dtype=jnp.float32)
    gt_s = jax.random.uniform(k2, shape, dtype=jnp.float32)
    mask = (jax.random.uniform(k3, shape) > 0.5).astype(jnp.float32)

    out = jax.block_until_ready(vac_loss(pred, gt_s, mask, **kwargs))
    ref = jax.block_until_ready(_vac_loss_ref(pred, gt_s, mask))
    assert jnp.allclose(out, ref, rtol=1e-5, atol=1e-5), (shape, kwargs, out, ref)


if __name__ == "__main__":
    key = jax.random.PRNGKey(0)
    keys = jax.random.split(key, 5)

    # Canonical small shape: single row tile, single part, full-width columns.
    _run_case(keys[0], (2, 4, 16, 16))
    # Multi row tile, auto 2-way "parallel" split (even tile count, no phantom tile).
    _run_case(keys[1], (4, 16, 16, 16), tile_rows=16)
    # Ragged row count (last tile partially masked in-kernel via reduced-moment selects).
    _run_case(keys[2], (7, 8, 16, 16), tile_rows=16)
    # Column-tiled path with a ragged trailing column tile + int8 mask streaming.
    _run_case(keys[3], (2, 2, 16, 40), tile_cols=256, mask_dtype=jnp.int8)
    # Long small-tile grid -> triple-buffered input pipeline (pl.Buffered(3)).
    _run_case(keys[4], (16, 8, 16, 16), tile_rows=16)

    print("KERNEL_OK")
</pallas_src>

<mosaic_0001>
module attributes {stable_mosaic.version = 11 : i64} {
  func.func @_vac_kernel(%arg0: i32, %arg1: i32, %arg2: i32, %arg3: memref<16x256xf32, #tpu.memory_space<vmem>>, %arg4: memref<16x256xf32, #tpu.memory_space<vmem>>, %arg5: memref<16x256xbf16, #tpu.memory_space<vmem>>, %arg6: memref<8x128xf32, #tpu.memory_space<vmem>>) attributes {dimension_semantics = [#tpu.dimension_semantics<parallel>, #tpu.dimension_semantics<arbitrary>, #tpu.dimension_semantics<arbitrary>], iteration_bounds = array<i64: 1, 1, 1>, scalar_prefetch = 0 : i64, scratch_operands = 0 : i64, tpu.core_type = #tpu.core_type<tc>, window_params = [{transform_indices = @transform_0, window_bounds = array<i64: 16, 256>}, {transform_indices = @transform_1, window_bounds = array<i64: 16, 256>}, {transform_indices = @transform_2, window_bounds = array<i64: 16, 256>}, {transform_indices = @transform_3, window_bounds = array<i64: 8, 128>}]} {
    %c0_i32 = arith.constant 0 : i32
    %0 = arith.cmpi eq, %arg1, %c0_i32 : i32
    %c0_i32_0 = arith.constant 0 : i32
    %1 = arith.cmpi eq, %arg2, %c0_i32_0 : i32
    %2 = arith.andi %0, %1 : i1
    %3 = arith.extui %2 : i1 to i32
    %c0_i32_1 = arith.constant 0 : i32
    %4 = arith.cmpi ne, %3, %c0_i32_1 : i32
    scf.if %4 {
      %cst_52 = arith.constant 0.000000e+00 : f32
      %155 = vector.broadcast %cst_52 : f32 to vector<8x128xf32>
      %c0_53 = arith.constant 0 : index
      %c0_54 = arith.constant 0 : index
      %156 = vector.load %arg6[%c0_53, %c0_54] : memref<8x128xf32, #tpu.memory_space<vmem>>, vector<8x128xf32>
      tpu.vector_store %arg6[%c0_53, %c0_54], %155 {strides = array<i32>} : memref<8x128xf32, #tpu.memory_space<vmem>>, vector<8x128xf32>,
    } else {
    }
    %c0 = arith.constant 0 : index
    %c0_2 = arith.constant 0 : index
    %5 = vector.load %arg3[%c0, %c0_2] : memref<16x256xf32, #tpu.memory_space<vmem>>, vector<16x256xf32>
    %c0_3 = arith.constant 0 : index
    %c0_4 = arith.constant 0 : index
    %6 = vector.load %arg4[%c0_3, %c0_4] : memref<16x256xf32, #tpu.memory_space<vmem>>, vector<16x256xf32>
    %c0_5 = arith.constant 0 : index
    %c0_6 = arith.constant 0 : index
    %7 = vector.load %arg5[%c0_5, %c0_6] : memref<16x256xbf16, #tpu.memory_space<vmem>>, vector<16x256xbf16>
    %8 = arith.extf %7 : vector<16x256xbf16> to vector<16x256xf32>
    %9 = arith.mulf %5, %6 : vector<16x256xf32>
    %cst = arith.constant dense<0.000000e+00> : vector<16xf32>
    %10 = vector.multi_reduction <add>, %5, %cst [1] : vector<16x256xf32> to vector<16xf32>
    %11 = vector.shape_cast %10 : vector<16xf32> to vector<16x1xf32>
    %cst_7 = arith.constant dense<0.000000e+00> : vector<16xf32>
    %12 = vector.multi_reduction <add>, %6, %cst_7 [1] : vector<16x256xf32> to vector<16xf32>
    %13 = vector.shape_cast %12 : vector<16xf32> to vector<16x1xf32>
    %14 = arith.mulf %5, %5 : vector<16x256xf32>
    %cst_8 = arith.constant dense<0.000000e+00> : vector<16xf32>
    %15 = vector.multi_reduction <add>, %14, %cst_8 [1] : vector<16x256xf32> to vector<16xf32>
    %16 = vector.shape_cast %15 : vector<16xf32> to vector<16x1xf32>
    %17 = arith.mulf %6, %6 : vector<16x256xf32>
    %cst_9 = arith.constant dense<0.000000e+00> : vector<16xf32>
    %18 = vector.multi_reduction <add>, %17, %cst_9 [1] : vector<16x256xf32> to vector<16xf32>
    %19 = vector.shape_cast %18 : vector<16xf32> to vector<16x1xf32>
    %cst_10 = arith.constant dense<0.000000e+00> : vector<16xf32>
    %20 = vector.multi_reduction <add>, %9, %cst_10 [1] : vector<16x256xf32> to vector<16xf32>
    %21 = vector.shape_cast %20 : vector<16xf32> to vector<16x1xf32>
    %cst_11 = arith.constant dense<0.000000e+00> : vector<16xf32>
    %22 = vector.multi_reduction <add>, %8, %cst_11 [1] : vector<16x256xf32> to vector<16xf32>
    %23 = vector.shape_cast %22 : vector<16xf32> to vector<16x1xf32>
    %24 = arith.mulf %8, %5 : vector<16x256xf32>
    %cst_12 = arith.constant dense<0.000000e+00> : vector<16xf32>
    %25 = vector.multi_reduction <add>, %24, %cst_12 [1] : vector<16x256xf32> to vector<16xf32>
    %26 = vector.shape_cast %25 : vector<16xf32> to vector<16x1xf32>
    %27 = arith.mulf %8, %6 : vector<16x256xf32>
    %cst_13 = arith.constant dense<0.000000e+00> : vector<16xf32>
    %28 = vector.multi_reduction <add>, %27, %cst_13 [1] : vector<16x256xf32> to vector<16xf32>
    %29 = vector.shape_cast %28 : vector<16xf32> to vector<16x1xf32>
    %30 = arith.mulf %8, %9 : vector<16x256xf32>
    %cst_14 = arith.constant dense<0.000000e+00> : vector<16xf32>
    %31 = vector.multi_reduction <add>, %30, %cst_14 [1] : vector<16x256xf32> to vector<16xf32>
    %32 = vector.shape_cast %31 : vector<16xf32> to vector<16x1xf32>
    %c1_i32 = arith.constant 1 : i32
    %33 = arith.muli %arg0, %c1_i32 : i32
    %34 = arith.addi %33, %arg1 : i32
    %c16_i32 = arith.constant 16 : i32
    %35 = arith.muli %34, %c16_i32 : i32
    %36 = tpu.iota {dimensions = array<i32: 0>} : vector<16x1xi32>
    %37 = vector.broadcast %35 : i32 to vector<16x1xi32>
    %38 = arith.addi %37, %36 : vector<16x1xi32>
    %c8_i32 = arith.constant 8 : i32
    %39 = vector.broadcast %c8_i32 : i32 to vector<16x1xi32>
    %40 = arith.cmpi slt, %38, %39 : vector<16x1xi32>
    %cst_15 = arith.constant 0.000000e+00 : f32
    %41 = vector.broadcast %cst_15 : f32 to vector<16x1xf32>
    %42 = arith.select %40, %11, %41 : vector<16x1xi1>, vector<16x1xf32>
    %cst_16 = arith.constant 0.000000e+00 : f32
    %43 = vector.broadcast %cst_16 : f32 to vector<16x1xf32>
    %44 = arith.select %40, %13, %43 : vector<16x1xi1>, vector<16x1xf32>
    %cst_17 = arith.constant 0.000000e+00 : f32
    %45 = vector.broadcast %cst_17 : f32 to vector<16x1xf32>
    %46 = arith.select %40, %16, %45 : vector<16x1xi1>, vector<16x1xf32>
    %cst_18 = arith.constant 0.000000e+00 : f32
    %47 = vector.broadcast %cst_18 : f32 to vector<16x1xf32>
    %48 = arith.select %40, %19, %47 : vector<16x1xi1>, vector<16x1xf32>
    %cst_19 = arith.constant 0.000000e+00 : f32
    %49 = vector.broadcast %cst_19 : f32 to vector<16x1xf32>
    %50 = arith.select %40, %21, %49 : vector<16x1xi1>, vector<16x1xf32>
    %cst_20 = arith.constant 0.000000e+00 : f32
    %51 = vector.broadcast %cst_20 : f32 to vector<16x1xf32>
    %52 = arith.select %40, %23, %51 : vector<16x1xi1>, vector<16x1xf32>
    %cst_21 = arith.constant 0.000000e+00 : f32
    %53 = vector.broadcast %cst_21 : f32 to vector<16x1xf32>
    %54 = arith.select %40, %26, %53 : vector<16x1xi1>, vector<16x1xf32>
    %cst_22 = arith.constant 0.000000e+00 : f32
    %55 = vector.broadcast %cst_22 : f32 to vector<16x1xf32>
    %56 = arith.select %40, %29, %55 : vector<16x1xi1>, vector<16x1xf32>
    %cst_23 = arith.constant 0.000000e+00 : f32
    %57 = vector.broadcast %cst_23 : f32 to vector<16x1xf32>
    %58 = arith.select %40, %32, %57 : vector<16x1xi1>, vector<16x1xf32>
    %cst_24 = arith.constant 3.906250e-03 : f32
    %59 = vector.broadcast %cst_24 : f32 to vector<16x1xf32>
    %60 = arith.mulf %42, %59 : vector<16x1xf32>
    %cst_25 = arith.constant 3.906250e-03 : f32
    %61 = vector.broadcast %cst_25 : f32 to vector<16x1xf32>
    %62 = arith.mulf %44, %61 : vector<16x1xf32>
    %63 = arith.mulf %42, %60 : vector<16x1xf32>
    %64 = arith.subf %46, %63 : vector<16x1xf32>
    %cst_26 = arith.constant 0.00392156886 : f32
    %65 = vector.broadcast %cst_26 : f32 to vector<16x1xf32>
    %66 = arith.mulf %64, %65 : vector<16x1xf32>
    %cst_27 = arith.constant 0.000000e+00 : f32
    %67 = vector.broadcast %cst_27 : f32 to vector<16x1xf32>
    %68 = arith.maximumf %66, %67 : vector<16x1xf32>
    %69 = arith.mulf %44, %62 : vector<16x1xf32>
    %70 = arith.subf %48, %69 : vector<16x1xf32>
    %cst_28 = arith.constant 0.00392156886 : f32
    %71 = vector.broadcast %cst_28 : f32 to vector<16x1xf32>
    %72 = arith.mulf %70, %71 : vector<16x1xf32>
    %cst_29 = arith.constant 0.000000e+00 : f32
    %73 = vector.broadcast %cst_29 : f32 to vector<16x1xf32>
    %74 = arith.maximumf %72, %73 : vector<16x1xf32>
    %75 = math.sqrt %68 : vector<16x1xf32>
    %76 = math.sqrt %74 : vector<16x1xf32>
    %cst_30 = arith.constant 1.1920929E-7 : f32
    %77 = vector.broadcast %cst_30 : f32 to vector<16x1xf32>
    %78 = arith.addf %75, %77 : vector<16x1xf32>
    %79 = tpu.reciprocal %78 : vector<16x1xf32> -> vector<16x1xf32>
    %cst_31 = arith.constant 0.000000e+00 : f32
    %80 = vector.broadcast %cst_31 : f32 to vector<16x1xf32>
    %81 = arith.select %40, %79, %80 : vector<16x1xi1>, vector<16x1xf32>
    %82 = tpu.reciprocal %76 : vector<16x1xf32> -> vector<16x1xf32>
    %cst_32 = arith.constant 0.000000e+00 : f32
    %83 = vector.broadcast %cst_32 : f32 to vector<16x1xf32>
    %84 = arith.select %40, %82, %83 : vector<16x1xi1>, vector<16x1xf32>
    %85 = arith.mulf %81, %84 : vector<16x1xf32>
    %86 = arith.mulf %60, %56 : vector<16x1xf32>
    %87 = arith.subf %58, %86 : vector<16x1xf32>
    %88 = arith.mulf %62, %54 : vector<16x1xf32>
    %89 = arith.subf %87, %88 : vector<16x1xf32>
    %90 = arith.mulf %60, %62 : vector<16x1xf32>
    %91 = arith.mulf %90, %52 : vector<16x1xf32>
    %92 = arith.addf %89, %91 : vector<16x1xf32>
    %93 = arith.mulf %92, %85 : vector<16x1xf32>
    %cst_33 = arith.constant 2.550000e+02 : f32
    %94 = vector.broadcast %cst_33 : f32 to vector<16x1xf32>
    %95 = arith.mulf %94, %68 : vector<16x1xf32>
    %96 = arith.mulf %81, %81 : vector<16x1xf32>
    %97 = arith.mulf %95, %96 : vector<16x1xf32>
    %cst_34 = arith.constant 2.550000e+02 : f32
    %98 = vector.broadcast %cst_34 : f32 to vector<16x1xf32>
    %99 = arith.mulf %98, %74 : vector<16x1xf32>
    %100 = arith.mulf %84, %84 : vector<16x1xf32>
    %101 = arith.mulf %99, %100 : vector<16x1xf32>
    %102 = arith.mulf %42, %62 : vector<16x1xf32>
    %103 = arith.subf %50, %102 : vector<16x1xf32>
    %104 = arith.mulf %103, %85 : vector<16x1xf32>
    %105 = tpu.iota {dimensions = array<i32: 1>} : vector<8x128xi32>
    %cst_35 = arith.constant 0.000000e+00 : f32
    %106 = vector.broadcast %cst_35 : f32 to vector<8x128xf32>
    %c0_i32_36 = arith.constant 0 : i32
    %107 = vector.broadcast %c0_i32_36 : i32 to vector<8x128xi32>
    %108 = arith.cmpi eq, %105, %107 : vector<8x128xi32>
    %cst_37 = arith.constant dense<0.000000e+00> : vector<1xf32>
    %109 = vector.multi_reduction <add>, %52, %cst_37 [0] : vector<16x1xf32> to vector<1xf32>
    %110 = vector.shape_cast %109 : vector<1xf32> to vector<1x1xf32>
    %cst_38 = arith.constant 0.000000e+00 : f32
    %111 = vector.shape_cast %110 : vector<1x1xf32> to vector<1x1xf32>
    %112 = vector.broadcast %111 : vector<1x1xf32> to vector<8x128xf32>
    %113 = vector.broadcast %cst_38 : f32 to vector<8x128xf32>
    %114 = arith.select %108, %112, %113 : vector<8x128xi1>, vector<8x128xf32>
    %115 = arith.addf %106, %114 : vector<8x128xf32>
    %c1_i32_39 = arith.constant 1 : i32
    %116 = vector.broadcast %c1_i32_39 : i32 to vector<8x128xi32>
    %117 = arith.cmpi eq, %105, %116 : vector<8x128xi32>
    %cst_40 = arith.constant dense<0.000000e+00> : vector<1xf32>
    %118 = vector.multi_reduction <add>, %93, %cst_40 [0] : vector<16x1xf32> to vector<1xf32>
    %119 = vector.shape_cast %118 : vector<1xf32> to vector<1x1xf32>
    %cst_41 = arith.constant 0.000000e+00 : f32
    %120 = vector.shape_cast %119 : vector<1x1xf32> to vector<1x1xf32>
    %121 = vector.broadcast %120 : vector<1x1xf32> to vector<8x128xf32>
    %122 = vector.broadcast %cst_41 : f32 to vector<8x128xf32>
    %123 = arith.select %117, %121, %122 : vector<8x128xi1>, vector<8x128xf32>
    %124 = arith.addf %115, %123 : vector<8x128xf32>
    %c2_i32 = arith.constant 2 : i32
    %125 = vector.broadcast %c2_i32 : i32 to vector<8x128xi32>
    %126 = arith.cmpi eq, %105, %125 : vector<8x128xi32>
    %cst_42 = arith.constant dense<0.000000e+00> : vector<1xf32>
    %127 = vector.multi_reduction <add>, %97, %cst_42 [0] : vector<16x1xf32> to vector<1xf32>
    %128 = vector.shape_cast %127 : vector<1xf32> to vector<1x1xf32>
    %cst_43 = arith.constant 0.000000e+00 : f32
    %129 = vector.shape_cast %128 : vector<1x1xf32> to vector<1x1xf32>
    %130 = vector.broadcast %129 : vector<1x1xf32> to vector<8x128xf32>
    %131 = vector.broadcast %cst_43 : f32 to vector<8x128xf32>
    %132 = arith.select %126, %130, %131 : vector<8x128xi1>, vector<8x128xf32>
    %133 = arith.addf %124, %132 : vector<8x128xf32>
    %c3_i32 = arith.constant 3 : i32
    %134 = vector.broadcast %c3_i32 : i32 to vector<8x128xi32>
    %135 = arith.cmpi eq, %105, %134 : vector<8x128xi32>
    %cst_44 = arith.constant dense<0.000000e+00> : vector<1xf32>
    %136 = vector.multi_reduction <add>, %101, %cst_44 [0] : vector<16x1xf32> to vector<1xf32>
    %137 = vector.shape_cast %136 : vector<1xf32> to vector<1x1xf32>
    %cst_45 = arith.constant 0.000000e+00 : f32
    %138 = vector.shape_cast %137 : vector<1x1xf32> to vector<1x1xf32>
    %139 = vector.broadcast %138 : vector<1x1xf32> to vector<8x128xf32>
    %140 = vector.broadcast %cst_45 : f32 to vector<8x128xf32>
    %141 = arith.select %135, %139, %140 : vector<8x128xi1>, vector<8x128xf32>
    %142 = arith.addf %133, %141 : vector<8x128xf32>
    %c4_i32 = arith.constant 4 : i32
    %143 = vector.broadcast %c4_i32 : i32 to vector<8x128xi32>
    %144 = arith.cmpi eq, %105, %143 : vector<8x128xi32>
    %cst_46 = arith.constant dense<0.000000e+00> : vector<1xf32>
    %145 = vector.multi_reduction <add>, %104, %cst_46 [0] : vector<16x1xf32> to vector<1xf32>
    %146 = vector.shape_cast %145 : vector<1xf32> to vector<1x1xf32>
    %cst_47 = arith.constant 0.000000e+00 : f32
    %147 = vector.shape_cast %146 : vector<1x1xf32> to vector<1x1xf32>
    %148 = vector.broadcast %147 : vector<1x1xf32> to vector<8x128xf32>
    %149 = vector.broadcast %cst_47 : f32 to vector<8x128xf32>
    %150 = arith.select %144, %148, %149 : vector<8x128xi1>, vector<8x128xf32>
    %151 = arith.addf %142, %150 : vector<8x128xf32>
    %c0_48 = arith.constant 0 : index
    %c0_49 = arith.constant 0 : index
    %152 = vector.load %arg6[%c0_48, %c0_49] : memref<8x128xf32, #tpu.memory_space<vmem>>, vector<8x128xf32>
    %153 = arith.addf %152, %151 : vector<8x128xf32>
    %c0_50 = arith.constant 0 : index
    %c0_51 = arith.constant 0 : index
    %154 = vector.load %arg6[%c0_50, %c0_51] : memref<8x128xf32, #tpu.memory_space<vmem>>, vector<8x128xf32>
    tpu.vector_store %arg6[%c0_50, %c0_51], %153 {strides = array<i32>} : memref<8x128xf32, #tpu.memory_space<vmem>>, vector<8x128xf32>,
    return
  }
  func.func @transform_0(%arg0: i32, %arg1: i32, %arg2: i32) -> (i32, i32) {
    %c1_i32 = arith.constant 1 : i32
    %0 = arith.muli %arg0, %c1_i32 : i32
    %1 = arith.addi %0, %arg1 : i32
    %c0_i32 = arith.constant 0 : i32
    %2 = arith.minsi %1, %c0_i32 : i32
    %c0_i32_0 = arith.constant 0 : i32
    return %2, %arg2 : i32, i32
  }
  func.func @transform_1(%arg0: i32, %arg1: i32, %arg2: i32) -> (i32, i32) {
    %c1_i32 = arith.constant 1 : i32
    %0 = arith.muli %arg0, %c1_i32 : i32
    %1 = arith.addi %0, %arg1 : i32
    %c0_i32 = arith.constant 0 : i32
    %2 = arith.minsi %1, %c0_i32 : i32
    %c0_i32_0 = arith.constant 0 : i32
    return %2, %arg2 : i32, i32
  }
  func.func @transform_2(%arg0: i32, %arg1: i32, %arg2: i32) -> (i32, i32) {
    %c1_i32 = arith.constant 1 : i32
    %0 = arith.muli %arg0, %c1_i32 : i32
    %1 = arith.addi %0, %arg1 : i32
    %c0_i32 = arith.constant 0 : i32
    %2 = arith.minsi %1, %c0_i32 : i32
    %c0_i32_0 = arith.constant 0 : i32
    return %2, %arg2 : i32, i32
  }
  func.func @transform_3(%arg0: i32, %arg1: i32, %arg2: i32) -> (i32, i32) {
    %c0_i32 = arith.constant 0 : i32
    %c0_i32_0 = arith.constant 0 : i32
    return %arg0, %c0_i32 : i32, i32
  }
}

</mosaic_0001>

<bundles_post_ra>
// kernel: tpu_custom_call.1
= control target key start
LH: loop header
LB: loop body
LE: loop exit
PB: predicated region body
PF: predicated region fallthrough
CT: control target
= control target key end

     0   :  { %8 = vsyncpa [#allocation3], 0  ;;  %s598_s0 = inlined_call_operand.hbm [shape: f32[8,256], index: 0, kind: input, shape index: {}]   ;;  %s599_s1 = inlined_call_operand.hbm [shape: f32[8,256], index: 1, kind: input, shape index: {}]   ;;  %s600_s2 = inlined_call_operand.hbm [shape: bf16[8,256], index: 2, kind: input, shape index: {}]   ;;  %s601_s3 = inlined_call_operand.hbm [shape: f32[8,128], index: 3, kind: output, shape index: {}]  }
   0x1   :  { %9 = vsyncpa [#allocation6], 0 }
   0x2   :  { %10 = vsyncpa [#allocation4], 0 }
   0x3   :  { %22 = vsyncadd [#allocation3], 256  ;;  %s522_s12 = smov [#allocation2]   ;;  %s428_s16 = scalar_lea.hbm %s598_s0, 256 }
   0x4   :  { %s28_s13 = sshll.u32 %s522_s12, 4  ;;  %p429_p0 = scmp.ne.s32.totalorder %s598_s0, %s428_s16  ;;  %s29_s13 = int_to_ptr.vmem [resolvable:$true] %s28_s13 }
   0x5   :  { %p432_p1 = scmp.lt.u32.totalorder %s428_s16, %s598_s0 }
   0x7   :  { %p434_p2 = pnand %p432_p1, %p429_p0 }
   0x9   :  { %437 = shalt.err (!%p434_p2)
}
   0xa   :  { %s438_s21 = scalar_lea.vmem %s29_s13, 256  ;;  %s442_s22 = scalar_lea.vmem %s29_s13, 512 }
   0xb   :  { %p439_p3 = scmp.ne.s32.totalorder %s29_s13, %s438_s21  ;;  %p443_p4 = scmp.lt.s32.totalorder %s29_s13, %s29_s13 }
   0xc   :  { %p444_p5 = scmp.lt.s32.totalorder %s442_s22, %s438_s21 }
   0xe   :  { %p445_p6 = por %p444_p5, %p443_p4 }
  0x10   :  { %p446_p7 = pnand %p445_p6, %p439_p3 }
  0x12   :  { %449 = shalt.err (!%p446_p7)
}
  0x13   :  { %s523_s23 = smov 256   ;;  %s524_s24 = smov 16  }
  0x14   :  { %34 = dma.hbm_to_vmem [thread:$0]  %s598_s0, 256, %s29_s13, [#allocation3], %s523_s23, %s523_s23, %s524_s24  }
  0x15   :  { %46 = vsyncadd [#allocation6], 256  ;;  %s525_s27 = smov [#allocation5]   ;;  %s450_s4 = scalar_lea.hbm %s599_s1, 256 }
  0x16   :  { %s52_s28 = sshll.u32 %s525_s27, 4  ;;  %p451_p8 = scmp.ne.s32.totalorder %s599_s1, %s450_s4  ;;  %s53_s28 = int_to_ptr.vmem [resolvable:$true] %s52_s28 }
  0x17   :  { %p454_p9 = scmp.lt.u32.totalorder %s450_s4, %s599_s1 }
  0x19   :  { %p456_p10 = pnand %p454_p9, %p451_p8 }
  0x1b   :  { %459 = shalt.err (!%p456_p10)
}
  0x1c   :  { %s460_s9 = scalar_lea.vmem %s53_s28, 256  ;;  %s464_s0 = scalar_lea.vmem %s53_s28, 512 }
  0x1d   :  { %p461_p11 = scmp.ne.s32.totalorder %s53_s28, %s460_s9  ;;  %p465_p12 = scmp.lt.s32.totalorder %s53_s28, %s53_s28 }
  0x1e   :  { %p466_p13 = scmp.lt.s32.totalorder %s464_s0, %s460_s9 }
  0x20   :  { %p467_p0 = por %p466_p13, %p465_p12 }
  0x22   :  { %p468_p1 = pnand %p467_p0, %p461_p11 }
  0x24   :  { %471 = shalt.err (!%p468_p1)
}
  0x25   :  { %58 = dma.hbm_to_vmem [thread:$0]  %s599_s1, 256, %s53_s28, [#allocation6], %s523_s23, %s523_s23, %s524_s24  }
  0x26   :  { %70 = vsyncadd [#allocation6], 128  ;;  %s526_s12 = smov [#allocation7]   ;;  %s472_s16 = scalar_lea.hbm %s600_s2, 128 }
  0x27   :  { %s76_s13 = sshll.u32 %s526_s12, 4  ;;  %p473_p2 = scmp.ne.s32.totalorder %s600_s2, %s472_s16  ;;  %s77_s13 = int_to_ptr.vmem [resolvable:$true] %s76_s13 }
  0x28   :  { %p476_p3 = scmp.lt.u32.totalorder %s472_s16, %s600_s2 }
  0x2a   :  { %p478_p4 = pnand %p476_p3, %p473_p2 }
  0x2c   :  { %481 = shalt.err (!%p478_p4)
}
  0x2d   :  { %s482_s21 = scalar_lea.vmem %s77_s13, 128  ;;  %s486_s1 = scalar_lea.vmem %s77_s13, 256 }
  0x2e   :  { %p483_p5 = scmp.ne.s32.totalorder %s77_s13, %s482_s21  ;;  %p487_p6 = scmp.lt.s32.totalorder %s77_s13, %s77_s13 }
  0x2f   :  { %p488_p7 = scmp.lt.s32.totalorder %s486_s1, %s482_s21 }
  0x31   :  { %p489_p8 = por %p488_p7, %p487_p6 }
  0x33   :  { %p490_p9 = pnand %p489_p8, %p483_p5 }
  0x35   :  { %493 = shalt.err (!%p490_p9)
}
  0x36   :  { %s527_s22 = smov 128   ;;  %s528_s23 = smov 8  }
  0x37   :  { %82 = dma.hbm_to_vmem [thread:$0]  %s600_s2, 128, %s77_s13, [#allocation6], %s527_s22, %s527_s22, %s528_s23  }
  0x38   :  { %516 = dma.done.wait [#allocation3], 512  }
  0x39   :  { %517 = vsyncadd [#allocation3], 4294966784 }
  0x3a   :  { %518 = dma.done.wait [#allocation6], 768  }
  0x3b   :  { %519 = vsyncadd [#allocation6], 4294966528  ;;  %v120_v0 = vld [vmem:[#allocation2] sm:$0xff]  ;;  %v121_v1 = vld [vmem:[#allocation2 + $0x8] sm:$0xff]  ;;  %s529_s2 = smov [#allocation8]  }
  0x3c   :  { %v124_v2 = vld [vmem:[#allocation5] sm:$0xff]  ;;  %v138_v3 = vadd.f32 %v121_v1, %v120_v0  ;;  %v150_v4 = vmul.f32 %v120_v0, %v120_v0  ;;  %v151_v5 = vmul.f32 %v121_v1, %v121_v1  ;;  %v125_v6 = vld [vmem:[#allocation5 + $0x8] sm:$0xff]  ;;  %s395_s26 = sshll.u32 %s529_s2, 4  ;;  %s396_s26 = int_to_ptr.vmem [resolvable:$true] %s395_s26 }
  0x3d   :  { %v160_v7 = vmul.f32 %v124_v2, %v124_v2  ;;  %v128_v8 = vld [vmem:[#allocation7] sm:$0xff]  ;;  %v161_v9 = vmul.f32 %v125_v6, %v125_v6  ;;  %v144_v13 = vadd.f32 %v125_v6, %v124_v2  ;;  %v134_v14 = vmul.f32 %v124_v2, %v120_v0  ;;  %s494_s27 = scalar_lea.vmem %s396_s26, 128  ;;  %p499_p11 = scmp.lt.s32.totalorder %s396_s26, %s396_s26 }
  0x3e   :  { %v130_v10 = vunpack.c.l.bf16 %v128_v8  ;;  %v131_v11 = vunpack.c.h.bf16 %v128_v8  ;;  %139 = vadd.xlane.f32.xlu0 %v138_v3  ;;  %v154_v12 = vadd.f32 %v151_v5, %v150_v4  ;;  %v135_v15 = vmul.f32 %v125_v6, %v121_v1  ;;  %p495_p10 = scmp.ne.s32.totalorder %s396_s26, %s494_s27  ;;  %p500_p12 = scmp.lt.s32.totalorder %s494_s27, %s494_s27 }
  0x3f   :  { %v164_v18 = vadd.f32 %v161_v9, %v160_v7 }
  0x40   :  { %v192_v16 = vmul.f32 %v130_v10, %v124_v2  ;;  %v193_v17 = vmul.f32 %v131_v11, %v125_v6  ;;  %155 = vadd.xlane.f32.xlu1 %v154_v12  ;;  %v182_v19 = vmul.f32 %v130_v10, %v120_v0  ;;  %v183_v20 = vmul.f32 %v131_v11, %v121_v1  ;;  %p501_p13 = por %p500_p12, %p499_p11 }
  0x41   :  { %v202_v22 = vmul.f32 %v134_v14, %v130_v10  ;;  %v203_v23 = vmul.f32 %v135_v15, %v131_v11  ;;  %v176_v26 = vadd.f32 %v131_v11, %v130_v10  ;;  %v170_v27 = vadd.f32 %v135_v15, %v134_v14 }
  0x42   :  { %145 = vadd.xlane.f32.xlu0 %v144_v13  ;;  %v196_v21 = vadd.f32 %v193_v17, %v192_v16  ;;  %v186_v24 = vadd.f32 %v183_v20, %v182_v19  ;;  %p502_p0 = pnand %p501_p13, %p495_p10 }
  0x43   :  { %v206_v25 = vadd.f32 %v203_v23, %v202_v22  ;;  %v334_v23 = vlaneseq }
  0x44   :  { %165 = vadd.xlane.f32.xlu1 %v164_v18 }
  0x46   :  { %197 = vadd.xlane.f32.xlu0 %v196_v21 }
  0x48   :  { %187 = vadd.xlane.f32.xlu1 %v186_v24 }
  0x4a   :  { %207 = vadd.xlane.f32.xlu0 %v206_v25 }
  0x4c   :  { %177 = vadd.xlane.f32.xlu1 %v176_v26 }
  0x4e   :  { %171 = vadd.xlane.f32.xlu0 %v170_v27 }
  0xcb   :  { %v140_v28 = vpop.xlane.xlu0 %139 }
  0xcc   :  { %v240_v29 = vmul.f32 0.00390625, %v140_v28 }
  0xcd   :  { %v156_v30 = vpop.xlane.xlu1 %155 }
  0xce   :  { %v244_v31 = vmul.f32 %v240_v29, %v140_v28 }
  0xcf   :  { %v146_v32 = vpop.xlane.xlu0 %145 }
  0xd0   :  { %v246_v33 = vsub.f32 %v156_v30, %v244_v31  ;;  %v242_v34 = vmul.f32 0.00390625, %v146_v32 }
  0xd1   :  { %v166_v37 = vpop.xlane.xlu1 %165 }
  0xd2   :  { %v248_v35 = vmul.f32 0.003921569, %v246_v33  ;;  %v252_v36 = vmul.f32 %v242_v34, %v146_v32  ;;  %v308_v61 = vmul.f32 %v242_v34, %v240_v29  ;;  %v328_v3 = vmul.f32 %v242_v34, %v140_v28 }
  0xd3   :  { %v198_v44 = vpop.xlane.xlu0 %197  ;;  %v335_v33 = vand.u32 127, %v334_v23 }
  0xd4   :  { %v250_v38 = vmax.f32 %v248_v35, 0.0  ;;  %v254_v39 = vsub.f32 %v166_v37, %v252_v36  ;;  %v300_v56 = vmul.f32 %v240_v29, %v198_v44 }
  0xd5   :  { %v188_v48 = vpop.xlane.xlu1 %187  ;;  %vm336_vm4 = vcmp.eq.s32.totalorder %v335_v33, 0  ;;  %vm346_vm5 = vcmp.eq.s32.totalorder %v335_v33, 1  ;;  %vm356_vm6 = vcmp.eq.s32.totalorder %v335_v33, 2  ;;  %vm366_vm7 = vcmp.eq.s32.totalorder %v335_v33, 3 }
  0xd6   :  { %420 = vrsqrt.f32 %v250_v38  ;;  %v256_v40 = vmul.f32 0.003921569, %v254_v39  ;;  %vm262_vm0 = vcmp.eq.f32.partialorder %v250_v38, inf  ;;  %v265_v45 = vand.u32 2147483648, %v250_v38 }
  0xd7   :  { %vm264_vm1 = vcmp.eq.f32.partialorder %v250_v38, 0.0  ;;  %v208_v54 = vpop.xlane.xlu0 %207  ;;  %v304_v60 = vmul.f32 %v242_v34, %v188_v48  ;;  %v316_v4 = vmul.f32 255.0, %v250_v38  ;;  %vm376_vm8 = vcmp.eq.s32.totalorder %v335_v33, 4 }
  0xd8   :  { %v258_v41 = vmax.f32 %v256_v40, 0.0  ;;  %v302_v58 = vsub.f32 %v208_v54, %v300_v56 }
  0xd9   :  { %v178_v57 = vpop.xlane.xlu1 %177 }
  0xda   :  { %422 = vrsqrt.f32 %v258_v41  ;;  %vm276_vm2 = vcmp.eq.f32.partialorder %v258_v41, inf  ;;  %v279_v52 = vand.u32 2147483648, %v258_v41  ;;  %vm278_vm3 = vcmp.eq.f32.partialorder %v258_v41, 0.0 }
  0xdb   :  { %v338_v59 = vrot.slane %v178_v57, 4  ;;  %v306_v62 = vsub.f32 %v302_v58, %v304_v60  ;;  %v310_v63 = vmul.f32 %v308_v61, %v178_v57  ;;  %v172_v2 = vpop.xlane.xlu0 %171  ;;  %v322_v9 = vmul.f32 255.0, %v258_v41 }
  0xdc   :  { %v330_v11 = vsub.f32 %v172_v2, %v328_v3 }
  0xdd   :  { %v339_v0 = vadd.f32 %v338_v59, %v178_v57  ;;  %v312_v7 = vadd.f32 %v310_v63, %v306_v62 }
  0xdf   :  { %v340_v8 = vrot.slane %v339_v0, 2 }
  0xe0   :  { %v421_v42 = vpop.eup %420 }
  0xe1   :  { %v261_v43 = vmul.f32 %v421_v42, %v250_v38  ;;  %v341_v18 = vadd.f32 %v340_v8, %v339_v0 }
  0xe3   :  { %v263_v46 = vsel %vm262_vm0, %v250_v38, %v261_v43  ;;  %v342_v28 = vrot.slane %v341_v18, 1 }
  0xe4   :  { %v423_v47 = vpop.eup %422  ;;  %v266_v49 = vsel %vm264_vm1, %v265_v45, %v263_v46 }
  0xe5   :  { %v275_v50 = vmul.f32 %v423_v47, %v258_v41  ;;  %v288_v51 = vadd.f32 1.1920929e-07, %v266_v49  ;;  %v343_v38 = vadd.f32 %v342_v28, %v341_v18 }
  0xe7   :  { %v277_v53 = vsel %vm276_vm2, %v258_v41, %v275_v50  ;;  %424 = vrcp.f32 %v288_v51  ;;  %v344_v44 = vsel %vm336_vm4, %v343_v38, 0.0 }
  0xe8   :  { %v280_v55 = vsel %vm278_vm3, %v279_v52, %v277_v53 }
  0xe9   :  { %426 = vrcp.f32 %v280_v55 }
  0xf1   :  { %v425_v1 = vpop.eup %424 }
  0xf2   :  { %v318_v5 = vmul.f32 %v425_v1, %v425_v1 }
  0xf3   :  { %v427_v6 = vpop.eup %426 }
  0xf4   :  { %v298_v10 = vmul.f32 %v427_v6, %v425_v1  ;;  %v320_v12 = vmul.f32 %v318_v5, %v316_v4  ;;  %v324_v13 = vmul.f32 %v427_v6, %v427_v6 }
  0xf6   :  { %v314_v14 = vmul.f32 %v312_v7, %v298_v10  ;;  %v332_v15 = vmul.f32 %v330_v11, %v298_v10  ;;  %v326_v16 = vmul.f32 %v324_v13, %v322_v9  ;;  %v358_v17 = vrot.slane %v320_v12, 4 }
  0xf8   :  { %v348_v19 = vrot.slane %v314_v14, 4  ;;  %v378_v20 = vrot.slane %v332_v15, 4  ;;  %v359_v21 = vadd.f32 %v358_v17, %v320_v12  ;;  %v368_v22 = vrot.slane %v326_v16, 4 }
  0xfa   :  { %v349_v24 = vadd.f32 %v348_v19, %v314_v14  ;;  %v379_v25 = vadd.f32 %v378_v20, %v332_v15  ;;  %v360_v26 = vrot.slane %v359_v21, 2  ;;  %v369_v27 = vadd.f32 %v368_v22, %v326_v16 }
  0xfc   :  { %v350_v29 = vrot.slane %v349_v24, 2  ;;  %v380_v30 = vrot.slane %v379_v25, 2  ;;  %v361_v31 = vadd.f32 %v360_v26, %v359_v21  ;;  %v370_v32 = vrot.slane %v369_v27, 2 }
  0xfe   :  { %v351_v34 = vadd.f32 %v350_v29, %v349_v24  ;;  %v381_v35 = vadd.f32 %v380_v30, %v379_v25  ;;  %v362_v36 = vrot.slane %v361_v31, 1  ;;  %v371_v37 = vadd.f32 %v370_v32, %v369_v27 }
 0x100   :  { %v352_v39 = vrot.slane %v351_v34, 1  ;;  %v372_v40 = vrot.slane %v371_v37, 1  ;;  %v382_v42 = vrot.slane %v381_v35, 1  ;;  %v363_v43 = vadd.f32 %v362_v36, %v361_v31 }
 0x102   :  { %v353_v41 = vadd.f32 %v352_v39, %v351_v34  ;;  %v373_v46 = vadd.f32 %v372_v40, %v371_v37  ;;  %v383_v48 = vadd.f32 %v382_v42, %v381_v35  ;;  %v364_v49 = vsel %vm356_vm6, %v363_v43, 0.0 }
 0x104   :  { %v354_v45 = vsel %vm346_vm5, %v353_v41, 0.0  ;;  %v374_v51 = vsel %vm366_vm7, %v373_v46, 0.0  ;;  %v384_v53 = vsel %vm376_vm8, %v383_v48, 0.0 }
 0x105   :  { %v355_v47 = vadd.f32 %v354_v45, %v344_v44 }
 0x107   :  { %v365_v50 = vadd.f32 %v364_v49, %v355_v47 }
 0x109   :  { %v375_v52 = vadd.f32 %v374_v51, %v365_v50 }
 0x10b   :  { %v385_v54 = vadd.f32 %v384_v53, %v375_v52 }
 0x10d   :  { %388 = vst [vmem:[#allocation8] sm:$0xff] %v385_v54 }
 0x10e   :  { %505 = shalt.err (!%p502_p0)
}
 0x10f   :  { %s506_s30 = scalar_lea.hbm %s601_s3, 128 }
 0x110   :  { %p507_p1 = scmp.ne.s32.totalorder %s601_s3, %s506_s30  ;;  %p510_p2 = scmp.lt.u32.totalorder %s506_s30, %s601_s3 }
 0x112   :  { %p512_p3 = pnand %p510_p2, %p507_p1 }
 0x114   :  { %515 = shalt.err (!%p512_p3)
}
 0x115   :  { %398 = dma.vmem_to_hbm [thread:$0]  %s396_s26, 128, %s601_s3, [#allocation4]  }
 0x116   :  { %520 = dma.done.wait [#allocation4], 128  }
 0x117   :  { %521 = vsyncadd [#allocation4], 4294967168 }
 0x118   :  { %402 = vsyncpa [#allocation3], 1 }
 0x119   :  { %403 = vsyncpa [#allocation6], 1 }
 0x11a   :  { %404 = vsyncpa [#allocation4], 1 }

</bundles_post_ra>
